<compile_context>
chip_gen: v7x
topology: tpu7x:2x2x1
jax: 0.10.0
libtpu: 0.0.40
codegen_flags: <defaults>
</compile_context>

<pallas_src>
import functools

import jax
import jax.numpy as jnp
from jax.experimental import pallas as pl
from jax.experimental.pallas import tpu as pltpu

NEG_SLOPE = 0.01  # torch.nn.LeakyReLU default negative_slope

INPUT_SIZE = 2
HIDDEN_SIZE = 2
OUTPUT_SIZE = 1

LANE = 128          # lane granularity (batch padding)
MAX_BATCH_TILE = 1024  # samples per grid step (lanes per tile)

# Packed parameter layout (flat f32[21]):
#   [ 0: 4)  w1 row-major (in, out)   [ 4: 6)  b1
#   [ 6:10)  w2 row-major             [10:12)  b2
#   [12:16)  w3 row-major             [16:18)  b3
#   [18:20)  w4 (2x1) row-major       [20:21)  b4
N_PARAMS = 21


def _leaky_relu(h):
    return jnp.where(h >= 0, h, NEG_SLOPE * h)


def mlp_kernel(params_ref, x_ref, o_ref):
    """Whole 4-layer MLP on one batch tile.

    params_ref: SMEM f32[21]   packed weights/biases (scalar reads).
    x_ref:      VMEM f32[2, TB] features on sublanes, batch on lanes.
    o_ref:      VMEM f32[1, TB] output row, batch on lanes.
    """
    x0 = x_ref[0:1, :]   # (1, TB) feature 0 for all samples in tile
    x1 = x_ref[1:2, :]   # (1, TB) feature 1

    def lin2(a0, a1, base):
        # y_j = a0 * w[0, j] + a1 * w[1, j] + b[j]   (all scalar broadcasts)
        w00 = params_ref[base + 0]
        w01 = params_ref[base + 1]
        w10 = params_ref[base + 2]
        w11 = params_ref[base + 3]
        b0 = params_ref[base + 4]
        b1 = params_ref[base + 5]
        h0 = a0 * w00 + a1 * w10 + b0
        h1 = a0 * w01 + a1 * w11 + b1
        return h0, h1

    h0, h1 = lin2(x0, x1, 0)
    h0, h1 = _leaky_relu(h0), _leaky_relu(h1)

    h0, h1 = lin2(h0, h1, 6)
    h0, h1 = _leaky_relu(h0), _leaky_relu(h1)

    h0, h1 = lin2(h0, h1, 12)
    h0, h1 = _leaky_relu(h0), _leaky_relu(h1)

    # Output layer: Linear(2 -> 1), no activation.
    w00 = params_ref[18]
    w10 = params_ref[19]
    b0 = params_ref[20]
    o_ref[...] = h0 * w00 + h1 * w10 + b0


def pack_params(params):
    """Pack all weights/biases into a flat f32[21] array (done once at init)."""
    flat = jnp.concatenate([
        params["w1"].reshape(-1), params["b1"],
        params["w2"].reshape(-1), params["b2"],
        params["w3"].reshape(-1), params["b3"],
        params["w4"].reshape(-1), params["b4"],
    ]).astype(jnp.float32)
    assert flat.shape == (N_PARAMS,), flat.shape
    return flat


def _round_up(n, m):
    return ((n + m - 1) // m) * m


@jax.jit
def feedforward_pallas(x, packed_params):
    """x: (B, 2) float32.  packed_params: f32[21].  Returns (B, 1) float32."""
    B = x.shape[0]
    tb = min(MAX_BATCH_TILE, _round_up(B, LANE))   # lanes per batch tile
    b_pad = _round_up(B, tb)
    nb = b_pad // tb

    # Batch-in-lanes layout: (features, batch), zero-padded tail.
    x_t = jnp.zeros((INPUT_SIZE, b_pad), jnp.float32).at[:, :B].set(
        x.astype(jnp.float32).T)

    out_t = pl.pallas_call(
        mlp_kernel,
        out_shape=jax.ShapeDtypeStruct((1, b_pad), jnp.float32),
        grid_spec=pltpu.PrefetchScalarGridSpec(
            num_scalar_prefetch=0,
            grid=(nb,),
            in_specs=[
                pl.BlockSpec(memory_space=pltpu.MemorySpace.SMEM),  # params
                pl.BlockSpec((INPUT_SIZE, tb), lambda i: (0, i)),   # x tile
            ],
            out_specs=pl.BlockSpec((1, tb), lambda i: (0, i)),
        ),
        compiler_params=pltpu.CompilerParams(
            dimension_semantics=("parallel",),
        ),
    )(packed_params, x_t)

    return out_t[0, :B][:, None]   # (B, 1)


def init_params(key):
    """Deterministic init mimicking PyTorch Linear's U(-1/sqrt(fan_in), 1/sqrt(fan_in))."""
    def linear_init(k, fan_in, fan_out):
        kw, kb = jax.random.split(k)
        bound = 1.0 / jnp.sqrt(fan_in)
        w = jax.random.uniform(kw, (fan_in, fan_out), jnp.float32, -bound, bound)
        b = jax.random.uniform(kb, (fan_out,), jnp.float32, -bound, bound)
        return w, b

    k1, k2, k3, k4 = jax.random.split(key, 4)
    w1, b1 = linear_init(k1, INPUT_SIZE, HIDDEN_SIZE)
    w2, b2 = linear_init(k2, HIDDEN_SIZE, HIDDEN_SIZE)
    w3, b3 = linear_init(k3, HIDDEN_SIZE, HIDDEN_SIZE)
    w4, b4 = linear_init(k4, HIDDEN_SIZE, OUTPUT_SIZE)
    return dict(w1=w1, b1=b1, w2=w2, b2=b2, w3=w3, b3=b3, w4=w4, b4=b4)


def feedforward_ref(x, p):
    """Pure-JAX reference for correctness check."""
    h = _leaky_relu(x @ p["w1"] + p["b1"])
    h = _leaky_relu(h @ p["w2"] + p["b2"])
    h = _leaky_relu(h @ p["w3"] + p["b3"])
    return h @ p["w4"] + p["b4"]


if __name__ == "__main__":
    key = jax.random.PRNGKey(0)
    k_param, k_x1, k_x2 = jax.random.split(key, 3)

    params = init_params(k_param)
    packed = pack_params(params)   # pack once, outside the hot path

    # Small test (module's natural shapes): batch=8, features=2.
    x_small = jax.random.normal(k_x1, (8, INPUT_SIZE), dtype=jnp.float32)
    out_small = jax.block_until_ready(feedforward_pallas(x_small, packed))
    ref_small = feedforward_ref(x_small, params)
    assert out_small.shape == (8, OUTPUT_SIZE), out_small.shape
    assert jnp.allclose(out_small, ref_small, atol=1e-5, rtol=1e-4)

    # Larger test to exercise the batch grid (>1 tile) and the padded tail.
    x_big = jax.random.normal(k_x2, (2500, INPUT_SIZE), dtype=jnp.float32)
    out_big = jax.block_until_ready(feedforward_pallas(x_big, packed))
    ref_big = feedforward_ref(x_big, params)
    assert out_big.shape == (2500, OUTPUT_SIZE), out_big.shape
    assert jnp.allclose(out_big, ref_big, atol=1e-5, rtol=1e-4)

    print("KERNEL_OK")
</pallas_src>

<mosaic_0001>
module attributes {stable_mosaic.version = 11 : i64} {
  func.func @mlp_kernel(%arg0: i32, %arg1: memref<21xf32, #tpu.memory_space<smem>>, %arg2: memref<2x128xf32, #tpu.memory_space<vmem>>, %arg3: memref<1x128xf32, #tpu.memory_space<vmem>>) attributes {dimension_semantics = [#tpu.dimension_semantics<parallel>], iteration_bounds = array<i64: 1>, scalar_prefetch = 0 : i64, scratch_operands = 0 : i64, tpu.core_type = #tpu.core_type<tc>, window_params = [{transform_indices = @transform_0, window_bounds = array<i64: 21>}, {transform_indices = @transform_1, window_bounds = array<i64: 2, 128>}, {transform_indices = @transform_2, window_bounds = array<i64: 1, 128>}]} {
    %c0 = arith.constant 0 : index
    %c0_0 = arith.constant 0 : index
    %0 = vector.load %arg2[%c0, %c0_0] : memref<2x128xf32, #tpu.memory_space<vmem>>, vector<1x128xf32>
    %c1 = arith.constant 1 : index
    %c0_1 = arith.constant 0 : index
    %1 = vector.load %arg2[%c1, %c0_1] : memref<2x128xf32, #tpu.memory_space<vmem>>, vector<1x128xf32>
    %c0_2 = arith.constant 0 : index
    %2 = memref.load %arg1[%c0_2] : memref<21xf32, #tpu.memory_space<smem>>
    %c1_3 = arith.constant 1 : index
    %3 = memref.load %arg1[%c1_3] : memref<21xf32, #tpu.memory_space<smem>>
    %c2 = arith.constant 2 : index
    %4 = memref.load %arg1[%c2] : memref<21xf32, #tpu.memory_space<smem>>
    %c3 = arith.constant 3 : index
    %5 = memref.load %arg1[%c3] : memref<21xf32, #tpu.memory_space<smem>>
    %c4 = arith.constant 4 : index
    %6 = memref.load %arg1[%c4] : memref<21xf32, #tpu.memory_space<smem>>
    %c5 = arith.constant 5 : index
    %7 = memref.load %arg1[%c5] : memref<21xf32, #tpu.memory_space<smem>>
    %8 = vector.broadcast %2 : f32 to vector<1x128xf32>
    %9 = arith.mulf %0, %8 : vector<1x128xf32>
    %10 = vector.broadcast %4 : f32 to vector<1x128xf32>
    %11 = arith.mulf %1, %10 : vector<1x128xf32>
    %12 = arith.addf %9, %11 : vector<1x128xf32>
    %13 = vector.broadcast %6 : f32 to vector<1x128xf32>
    %14 = arith.addf %12, %13 : vector<1x128xf32>
    %15 = vector.broadcast %3 : f32 to vector<1x128xf32>
    %16 = arith.mulf %0, %15 : vector<1x128xf32>
    %17 = vector.broadcast %5 : f32 to vector<1x128xf32>
    %18 = arith.mulf %1, %17 : vector<1x128xf32>
    %19 = arith.addf %16, %18 : vector<1x128xf32>
    %20 = vector.broadcast %7 : f32 to vector<1x128xf32>
    %21 = arith.addf %19, %20 : vector<1x128xf32>
    %cst = arith.constant 0.000000e+00 : f32
    %22 = vector.broadcast %cst : f32 to vector<1x128xf32>
    %23 = arith.cmpf oge, %14, %22 : vector<1x128xf32>
    %cst_4 = arith.constant 0.00999999977 : f32
    %24 = vector.broadcast %cst_4 : f32 to vector<1x128xf32>
    %25 = arith.mulf %24, %14 : vector<1x128xf32>
    %26 = arith.select %23, %14, %25 : vector<1x128xi1>, vector<1x128xf32>
    %cst_5 = arith.constant 0.000000e+00 : f32
    %27 = vector.broadcast %cst_5 : f32 to vector<1x128xf32>
    %28 = arith.cmpf oge, %21, %27 : vector<1x128xf32>
    %cst_6 = arith.constant 0.00999999977 : f32
    %29 = vector.broadcast %cst_6 : f32 to vector<1x128xf32>
    %30 = arith.mulf %29, %21 : vector<1x128xf32>
    %31 = arith.select %28, %21, %30 : vector<1x128xi1>, vector<1x128xf32>
    %c6 = arith.constant 6 : index
    %32 = memref.load %arg1[%c6] : memref<21xf32, #tpu.memory_space<smem>>
    %c7 = arith.constant 7 : index
    %33 = memref.load %arg1[%c7] : memref<21xf32, #tpu.memory_space<smem>>
    %c8 = arith.constant 8 : index
    %34 = memref.load %arg1[%c8] : memref<21xf32, #tpu.memory_space<smem>>
    %c9 = arith.constant 9 : index
    %35 = memref.load %arg1[%c9] : memref<21xf32, #tpu.memory_space<smem>>
    %c10 = arith.constant 10 : index
    %36 = memref.load %arg1[%c10] : memref<21xf32, #tpu.memory_space<smem>>
    %c11 = arith.constant 11 : index
    %37 = memref.load %arg1[%c11] : memref<21xf32, #tpu.memory_space<smem>>
    %38 = vector.broadcast %32 : f32 to vector<1x128xf32>
    %39 = arith.mulf %26, %38 : vector<1x128xf32>
    %40 = vector.broadcast %34 : f32 to vector<1x128xf32>
    %41 = arith.mulf %31, %40 : vector<1x128xf32>
    %42 = arith.addf %39, %41 : vector<1x128xf32>
    %43 = vector.broadcast %36 : f32 to vector<1x128xf32>
    %44 = arith.addf %42, %43 : vector<1x128xf32>
    %45 = vector.broadcast %33 : f32 to vector<1x128xf32>
    %46 = arith.mulf %26, %45 : vector<1x128xf32>
    %47 = vector.broadcast %35 : f32 to vector<1x128xf32>
    %48 = arith.mulf %31, %47 : vector<1x128xf32>
    %49 = arith.addf %46, %48 : vector<1x128xf32>
    %50 = vector.broadcast %37 : f32 to vector<1x128xf32>
    %51 = arith.addf %49, %50 : vector<1x128xf32>
    %cst_7 = arith.constant 0.000000e+00 : f32
    %52 = vector.broadcast %cst_7 : f32 to vector<1x128xf32>
    %53 = arith.cmpf oge, %44, %52 : vector<1x128xf32>
    %cst_8 = arith.constant 0.00999999977 : f32
    %54 = vector.broadcast %cst_8 : f32 to vector<1x128xf32>
    %55 = arith.mulf %54, %44 : vector<1x128xf32>
    %56 = arith.select %53, %44, %55 : vector<1x128xi1>, vector<1x128xf32>
    %cst_9 = arith.constant 0.000000e+00 : f32
    %57 = vector.broadcast %cst_9 : f32 to vector<1x128xf32>
    %58 = arith.cmpf oge, %51, %57 : vector<1x128xf32>
    %cst_10 = arith.constant 0.00999999977 : f32
    %59 = vector.broadcast %cst_10 : f32 to vector<1x128xf32>
    %60 = arith.mulf %59, %51 : vector<1x128xf32>
    %61 = arith.select %58, %51, %60 : vector<1x128xi1>, vector<1x128xf32>
    %c12 = arith.constant 12 : index
    %62 = memref.load %arg1[%c12] : memref<21xf32, #tpu.memory_space<smem>>
    %c13 = arith.constant 13 : index
    %63 = memref.load %arg1[%c13] : memref<21xf32, #tpu.memory_space<smem>>
    %c14 = arith.constant 14 : index
    %64 = memref.load %arg1[%c14] : memref<21xf32, #tpu.memory_space<smem>>
    %c15 = arith.constant 15 : index
    %65 = memref.load %arg1[%c15] : memref<21xf32, #tpu.memory_space<smem>>
    %c16 = arith.constant 16 : index
    %66 = memref.load %arg1[%c16] : memref<21xf32, #tpu.memory_space<smem>>
    %c17 = arith.constant 17 : index
    %67 = memref.load %arg1[%c17] : memref<21xf32, #tpu.memory_space<smem>>
    %68 = vector.broadcast %62 : f32 to vector<1x128xf32>
    %69 = arith.mulf %56, %68 : vector<1x128xf32>
    %70 = vector.broadcast %64 : f32 to vector<1x128xf32>
    %71 = arith.mulf %61, %70 : vector<1x128xf32>
    %72 = arith.addf %69, %71 : vector<1x128xf32>
    %73 = vector.broadcast %66 : f32 to vector<1x128xf32>
    %74 = arith.addf %72, %73 : vector<1x128xf32>
    %75 = vector.broadcast %63 : f32 to vector<1x128xf32>
    %76 = arith.mulf %56, %75 : vector<1x128xf32>
    %77 = vector.broadcast %65 : f32 to vector<1x128xf32>
    %78 = arith.mulf %61, %77 : vector<1x128xf32>
    %79 = arith.addf %76, %78 : vector<1x128xf32>
    %80 = vector.broadcast %67 : f32 to vector<1x128xf32>
    %81 = arith.addf %79, %80 : vector<1x128xf32>
    %cst_11 = arith.constant 0.000000e+00 : f32
    %82 = vector.broadcast %cst_11 : f32 to vector<1x128xf32>
    %83 = arith.cmpf oge, %74, %82 : vector<1x128xf32>
    %cst_12 = arith.constant 0.00999999977 : f32
    %84 = vector.broadcast %cst_12 : f32 to vector<1x128xf32>
    %85 = arith.mulf %84, %74 : vector<1x128xf32>
    %86 = arith.select %83, %74, %85 : vector<1x128xi1>, vector<1x128xf32>
    %cst_13 = arith.constant 0.000000e+00 : f32
    %87 = vector.broadcast %cst_13 : f32 to vector<1x128xf32>
    %88 = arith.cmpf oge, %81, %87 : vector<1x128xf32>
    %cst_14 = arith.constant 0.00999999977 : f32
    %89 = vector.broadcast %cst_14 : f32 to vector<1x128xf32>
    %90 = arith.mulf %89, %81 : vector<1x128xf32>
    %91 = arith.select %88, %81, %90 : vector<1x128xi1>, vector<1x128xf32>
    %c18 = arith.constant 18 : index
    %92 = memref.load %arg1[%c18] : memref<21xf32, #tpu.memory_space<smem>>
    %c19 = arith.constant 19 : index
    %93 = memref.load %arg1[%c19] : memref<21xf32, #tpu.memory_space<smem>>
    %c20 = arith.constant 20 : index
    %94 = memref.load %arg1[%c20] : memref<21xf32, #tpu.memory_space<smem>>
    %95 = vector.broadcast %92 : f32 to vector<1x128xf32>
    %96 = arith.mulf %86, %95 : vector<1x128xf32>
    %97 = vector.broadcast %93 : f32 to vector<1x128xf32>
    %98 = arith.mulf %91, %97 : vector<1x128xf32>
    %99 = arith.addf %96, %98 : vector<1x128xf32>
    %100 = vector.broadcast %94 : f32 to vector<1x128xf32>
    %101 = arith.addf %99, %100 : vector<1x128xf32>
    %c0_15 = arith.constant 0 : index
    %c0_16 = arith.constant 0 : index
    %102 = vector.load %arg3[%c0_15, %c0_16] : memref<1x128xf32, #tpu.memory_space<vmem>>, vector<1x128xf32>
    tpu.vector_store %arg3[%c0_15, %c0_16], %101 {strides = array<i32>} : memref<1x128xf32, #tpu.memory_space<vmem>>, vector<1x128xf32>,
    return
  }
  func.func @transform_0(%arg0: i32) -> i32 {
    %c0_i32 = arith.constant 0 : i32
    %c0_i32_0 = arith.constant 0 : i32
    return %c0_i32 : i32
  }
  func.func @transform_1(%arg0: i32) -> (i32, i32) {
    %c0_i32 = arith.constant 0 : i32
    %c0_i32_0 = arith.constant 0 : i32
    return %c0_i32, %arg0 : i32, i32
  }
  func.func @transform_2(%arg0: i32) -> (i32, i32) {
    %c0_i32 = arith.constant 0 : i32
    %c0_i32_0 = arith.constant 0 : i32
    return %c0_i32, %arg0 : i32, i32
  }
}

</mosaic_0001>

<bundles_post_ra>
// kernel: feedforward_pallas.1
= control target key start
LH: loop header
LB: loop body
LE: loop exit
PB: predicated region body
PF: predicated region fallthrough
CT: control target
= control target key end

     0   :  { %7 = vsyncpa [#allocation3], 0  ;;  %s198_s0 = inlined_call_operand.vmem [shape: f32[21], index: 0, kind: input, shape index: {}]   ;;  %s199_s1 = inlined_call_operand.vmem [shape: f32[2,128], index: 1, kind: input, shape index: {}]   ;;  %s200_s2 = inlined_call_operand.vmem [shape: f32[1,128], index: 2, kind: output, shape index: {}]  }
   0x1   :  { %s14_s11 = sshll.u32 %s198_s0, 4  ;;  %s15_s11 = int_to_ptr.vmem [resolvable:$true] %s14_s11 }
   0x2   :  { %s141_s12 = scalar_lea.vmem %s15_s11, 16  ;;  %p146_p1 = scmp.lt.s32.totalorder %s15_s11, %s15_s11 }
   0x3   :  { %p142_p0 = scmp.ne.s32.totalorder %s15_s11, %s141_s12  ;;  %p147_p2 = scmp.lt.s32.totalorder %s141_s12, %s141_s12 }
   0x5   :  { %p148_p3 = por %p147_p2, %p146_p1 }
   0x7   :  { %p149_p4 = pnand %p148_p3, %p142_p0 }
   0x9   :  { %152 = shalt.err (!%p149_p4)
}
   0xa   :  { %s155_s13 = smov [#allocation2]  }
   0xb   :  { %17 = dma.vmem_to_smem %s15_s11, 16, %s155_s13, [#allocation3]  }
   0xc   :  { %153 = dma.done.wait [#allocation3], 16  }
   0xd   :  { %154 = vsyncadd [#allocation3], 4294967280 }
   0xe   :  { %23 = sfence }
   0xf   :  { %s26_s14 = sld [smem:[#allocation2]]  ;;  %s120_s15 = sld [smem:[#allocation2 + $0x1]]  ;;  %v24_v0 = vld [vmem:[%s199_s1] sm:$0x1]  ;;  %v25_v1 = vld [vmem:[%s199_s1 + $0x1] sm:$0x1] }
  0x10   :  { %s121_s16 = sld [smem:[#allocation2 + $0x2]]  ;;  %s122_s17 = sld [smem:[#allocation2 + $0x3]] }
  0x11   :  { %s123_s18 = sld [smem:[#allocation2 + $0x4]]  ;;  %s124_s19 = sld [smem:[#allocation2 + $0x5]] }
  0x12   :  { %s180_s23 = sld [smem:[#allocation2 + $0x6]]  ;;  %s182_s24 = sld [smem:[#allocation2 + $0x7]] }
  0x13   :  { %s127_s25 = sld [smem:[#allocation2 + $0x8]]  ;;  %s128_s26 = sld [smem:[#allocation2 + $0x9]] }
  0x14   :  { %s129_s1 = sld [smem:[#allocation2 + $0xa]]  ;;  %s130_s27 = sld [smem:[#allocation2 + $0xb]] }
  0x15   :  { %v32_v2 = vstv %s26_s14  ;;  %v39_v5 = vstv %s120_s15  ;;  %s184_s28 = sld [smem:[#allocation2 + $0xc]]  ;;  %s186_s29 = sld [smem:[#allocation2 + $0xd]] }
  0x16   :  { %v33_v3 = vmul.f32 %v32_v2, %v24_v0  ;;  %v34_v4 = vstv %s121_s16  ;;  %v40_v7 = vmul.f32 %v39_v5, %v24_v0  ;;  %v41_v8 = vstv %s122_s17  ;;  %s190_s30 = sld [smem:[#allocation2 + $0xe]]  ;;  %s134_s3 = sld [smem:[#allocation2 + $0xf]] }
  0x17   :  { %v35_v6 = vmul.f32 %v34_v4, %v25_v1  ;;  %v37_v9 = vstv %s123_s18  ;;  %v42_v10 = vmul.f32 %v41_v8, %v25_v1  ;;  %v44_v12 = vstv %s124_s19  ;;  %s135_s4 = sld [smem:[#allocation2 + $0x10]]  ;;  %s136_s5 = sld [smem:[#allocation2 + $0x11]] }
  0x18   :  { %v58_v17 = vstv %s180_s23  ;;  %v65_v18 = vstv %s182_s24  ;;  %s137_s6 = sld [smem:[#allocation2 + $0x12]]  ;;  %s138_s7 = sld [smem:[#allocation2 + $0x13]] }
  0x19   :  { %v36_v11 = vadd.f32 %v35_v6, %v33_v3  ;;  %v43_v13 = vadd.f32 %v42_v10, %v40_v7  ;;  %v60_v20 = vstv %s127_s25  ;;  %v67_v21 = vstv %s128_s26  ;;  %s139_s8 = sld [smem:[#allocation2 + $0x14]] }
  0x1a   :  { %v63_v28 = vstv %s129_s1  ;;  %v70_v29 = vstv %s130_s27 }
  0x1b   :  { %v38_v14 = vadd.f32 %v37_v9, %v36_v11  ;;  %v45_v15 = vadd.f32 %v44_v12, %v43_v13  ;;  %v84_v34 = vstv %s184_s28  ;;  %v91_v36 = vstv %s186_s29 }
  0x1c   :  { %v86_v35 = vstv %s190_s30  ;;  %v93_v37 = vstv %s134_s3 }
  0x1d   :  { %vm46_vm0 = vcmp.ge.f32.partialorder %v38_v14, 0.0  ;;  %v47_v16 = vmul.f32 0.01, %v38_v14  ;;  %vm49_vm1 = vcmp.ge.f32.partialorder %v45_v15, 0.0  ;;  %v50_v19 = vmul.f32 0.01, %v45_v15 }
  0x1e   :  { %v89_v46 = vstv %s135_s4  ;;  %v96_v47 = vstv %s136_s5  ;;  %v107_v52 = vstv %s137_s6  ;;  %v109_v53 = vstv %s138_s7 }
  0x1f   :  { %v48_v22 = vsel %vm46_vm0, %v38_v14, %v47_v16  ;;  %v51_v23 = vsel %vm49_vm1, %v45_v15, %v50_v19  ;;  %v112_v60 = vstv %s139_s8 }
  0x20   :  { %v59_v24 = vmul.f32 %v58_v17, %v48_v22  ;;  %v66_v25 = vmul.f32 %v65_v18, %v48_v22  ;;  %v61_v26 = vmul.f32 %v60_v20, %v51_v23  ;;  %v68_v27 = vmul.f32 %v67_v21, %v51_v23 }
  0x22   :  { %v62_v30 = vadd.f32 %v61_v26, %v59_v24  ;;  %v69_v31 = vadd.f32 %v68_v27, %v66_v25 }
  0x24   :  { %v64_v32 = vadd.f32 %v63_v28, %v62_v30  ;;  %v71_v33 = vadd.f32 %v70_v29, %v69_v31 }
  0x26   :  { %vm72_vm2 = vcmp.ge.f32.partialorder %v64_v32, 0.0  ;;  %v73_v38 = vmul.f32 0.01, %v64_v32  ;;  %vm75_vm3 = vcmp.ge.f32.partialorder %v71_v33, 0.0  ;;  %v76_v39 = vmul.f32 0.01, %v71_v33 }
  0x28   :  { %v74_v40 = vsel %vm72_vm2, %v64_v32, %v73_v38  ;;  %v77_v41 = vsel %vm75_vm3, %v71_v33, %v76_v39 }
  0x29   :  { %v85_v42 = vmul.f32 %v84_v34, %v74_v40  ;;  %v87_v43 = vmul.f32 %v86_v35, %v77_v41  ;;  %v92_v44 = vmul.f32 %v91_v36, %v74_v40  ;;  %v94_v45 = vmul.f32 %v93_v37, %v77_v41 }
  0x2b   :  { %v88_v48 = vadd.f32 %v87_v43, %v85_v42  ;;  %v95_v49 = vadd.f32 %v94_v45, %v92_v44 }
  0x2d   :  { %v90_v50 = vadd.f32 %v89_v46, %v88_v48  ;;  %v97_v51 = vadd.f32 %v96_v47, %v95_v49 }
  0x2f   :  { %vm98_vm4 = vcmp.ge.f32.partialorder %v90_v50, 0.0  ;;  %v99_v54 = vmul.f32 0.01, %v90_v50  ;;  %vm101_vm5 = vcmp.ge.f32.partialorder %v97_v51, 0.0  ;;  %v102_v55 = vmul.f32 0.01, %v97_v51 }
  0x31   :  { %v100_v56 = vsel %vm98_vm4, %v90_v50, %v99_v54  ;;  %v103_v57 = vsel %vm101_vm5, %v97_v51, %v102_v55 }
  0x32   :  { %v108_v58 = vmul.f32 %v107_v52, %v100_v56  ;;  %v110_v59 = vmul.f32 %v109_v53, %v103_v57 }
  0x34   :  { %v111_v61 = vadd.f32 %v110_v59, %v108_v58 }
  0x36   :  { %v113_v62 = vadd.f32 %v112_v60, %v111_v61 }
  0x38   :  { %114 = vst [vmem:[%s200_s2] sm:$0x1] %v113_v62 }
  0x39   :  { %119 = vsyncpa [#allocation3], 1 }

</bundles_post_ra>
